<compile_context>
chip_gen: v7x
topology: tpu7x:2x2x1
jax: 0.10.0
libtpu: 0.0.40
codegen_flags: <defaults>
</compile_context>

<pallas_src>
import math
import functools

import jax
import jax.numpy as jnp
from jax import lax
from jax.experimental import pallas as pl
from jax.experimental.pallas import tpu as pltpu


def _round_up(x: int, m: int) -> int:
    return ((x + m - 1) // m) * m


def _vmem_budget_bytes() -> int:
    """Per-generation usable VMEM budget for this kernel's working set."""
    cap = 64 * 2**20  # conservative fallback == v7x per-TC VMEM
    try:
        info = pltpu.get_tpu_info()
        c = int(getattr(info, "vmem_capacity_bytes", 0))
        if c > 0:
            cap = c
    except Exception:
        pass
    if cap >= 100 * 2**20:     # v5e / v6e: 128 MiB physical
        return 96 * 2**20
    return 48 * 2**20          # v7x: 64 MiB per TensorCore


def _num_tensorcores() -> int:
    try:
        d = jax.devices()[0]
        n = getattr(d, "num_cores", None) or getattr(d, "core_count", None)
        return int(n) if n else 1
    except Exception:
        return 1


def _resident_kwargs():
    # Single-buffer constant-index blocks (U, bias) when the API supports it.
    if hasattr(pl, "Buffered"):
        return {"pipeline_mode": pl.Buffered(1)}
    return {}


def _low_rank_kernel(x_ref, u_ref, vt_ref, b_ref, o_ref, t_ref, *, nj_inner, tn):
    """One (TB, TN) output tile of y = x @ U^T @ V^T + bias.

    x_ref : (TB, in_pad)          batch tile of activations (compute dtype)
    u_ref : (rank_spad, in_pad)   resident low-rank factor U
    vt_ref: (rank_spad, TN)       out_dim tile of V^T (rank-major rows)
    b_ref : (1, out_pad)          resident bias (f32), sliced per tile
    o_ref : (TB, TN)              output tile
    t_ref : (TB, rank_spad)       VMEM scratch: x_tile @ U^T, reused across j
    """
    # Invariant: t depends only on the batch tile -> compute it once per
    # (split, batch) grid point, at the first inner-j step.  The inner j axis
    # MUST stay innermost and "arbitrary" for this reuse to be valid.
    @pl.when(pl.program_id(2) == 0)
    def _():
        t_ref[...] = lax.dot_general(
            x_ref[...],
            u_ref[...],
            dimension_numbers=(((1,), (1,)), ((), ())),  # contract in_dim (A @ B^T)
            preferred_element_type=jnp.float32,
        ).astype(t_ref.dtype)

    # y_tile = t @ V^T-tile -> (TB, TN), f32 accumulation on the MXU.
    y = jnp.dot(t_ref[...], vt_ref[...], preferred_element_type=jnp.float32)

    j = pl.program_id(0) * nj_inner + pl.program_id(2)
    b = b_ref[:, pl.ds(pl.multiple_of(j * tn, 128), tn)]
    o_ref[...] = (y + b.astype(jnp.float32)).astype(o_ref.dtype)


def make_low_rank_linear(weight_u, weight_v, bias, *, compute_dtype=None):
    """Returns fn(x) computing x @ U^T @ V^T + bias (LowRankLinear.forward).

    Weight padding / transposition is done ONCE here (not per call).
    """
    rank, in_dim = weight_u.shape
    out_dim = weight_v.shape[0]
    cdt = jnp.dtype(compute_dtype) if compute_dtype is not None else jnp.dtype(weight_u.dtype)
    itm = cdt.itemsize
    sub = 32 // itm                      # packed sublane rows: 8 f32 / 16 bf16

    in_pad = _round_up(in_dim, 128)      # lane-dense contraction dim
    out_pad = _round_up(out_dim, 128)    # lane-dense output dim
    rank_spad = _round_up(rank, sub)     # rank only padded to sublane minimum

    # ---- one-time weight padding (hoisted out of the per-call path) -------
    up = jnp.zeros((rank_spad, in_pad), cdt).at[:rank, :in_dim].set(weight_u.astype(cdt))
    vtp = jnp.zeros((rank_spad, out_pad), cdt).at[:rank, :out_dim].set(weight_v.T.astype(cdt))
    bp = jnp.zeros((1, out_pad), jnp.float32).at[0, :out_dim].set(bias.astype(jnp.float32))

    budget = _vmem_budget_bytes()
    n_cores = _num_tensorcores()
    resident_kw = _resident_kwargs()

    @jax.jit
    def fwd(x, up, vtp, bp):
        B = x.shape[0]
        assert x.shape[1] == in_dim
        out_dtype = x.dtype
        o_itm = jnp.dtype(out_dtype).itemsize

        # ---- tile selection (static shapes at trace time) ------------------
        tb_cap = 512 if budget > 64 * 2**20 else 256
        TB = min(_round_up(B, sub), tb_cap)
        # Guard the x tile against the per-generation VMEM budget (large in_dim).
        while TB > sub and 2 * TB * in_pad * itm > budget // 2:
            TB = max(sub, TB // 2)
        # TODO(synk): add a K (in_dim) grid axis accumulating t in scratch when
        # even TB == sub overflows the budget; not needed at current shapes.
        B_pad = _round_up(B, TB)
        nb = B_pad // TB

        def vmem_use(tn):
            return (2 * TB * in_pad * itm          # x tile (double-buffered)
                    + rank_spad * in_pad * itm     # U (resident, single buffer)
                    + 2 * rank_spad * tn * itm     # V^T tile (double-buffered)
                    + out_pad * 4                  # bias (resident, single buffer)
                    + 2 * TB * tn * o_itm          # output tile (double-buffered)
                    + TB * rank_spad * itm)        # t scratch

        # Largest lane-dense out_dim tile that fits; collapse nj to 1 if possible.
        TN = 128
        for cand in [out_pad] + [c for c in (4096, 2048, 1024, 512, 256)
                                 if c < out_pad and out_pad % c == 0]:
            if vmem_use(cand) <= budget:
                TN = cand
                break
        nj = out_pad // TN

        # Small-batch megacore split (v7x): give both cores out_dim work.
        n_split = 1
        if n_cores >= 2 and nb == 1:
            if nj == 1 and TN % 256 == 0:
                TN //= 2
                nj = out_pad // TN
            if nj % 2 == 0:
                n_split = 2
        nj_inner = nj // n_split

        # ---- pad activations only when actually misaligned -----------------
        xp = x.astype(cdt)
        if B_pad != B or in_pad != in_dim:
            xp = jnp.zeros((B_pad, in_pad), cdt).at[:B, :in_dim].set(xp)

        kernel = functools.partial(_low_rank_kernel, nj_inner=nj_inner, tn=TN)

        cost = pl.CostEstimate(
            flops=2 * B * rank * in_dim + 2 * B * out_dim * rank,
            transcendentals=0,
            bytes_accessed=(xp.size * itm + up.size * itm + vtp.size * itm
                            + bp.size * 4 + B_pad * out_pad * o_itm),
        )

        y_pad = pl.pallas_call(
            kernel,
            out_shape=jax.ShapeDtypeStruct((B_pad, out_pad), out_dtype),
            grid_spec=pltpu.PrefetchScalarGridSpec(
                num_scalar_prefetch=0,
                grid=(n_split, nb, nj_inner),
                in_specs=[
                    # x: per batch tile, re-used across the j axis.
                    pl.BlockSpec((TB, in_pad), lambda s, i, j: (i, 0)),
                    # U: fully resident, constant index, single-buffered.
                    pl.BlockSpec((rank_spad, in_pad), lambda s, i, j: (0, 0),
                                 **resident_kw),
                    # V^T: (rank_spad, TN) out_dim-major tile.
                    pl.BlockSpec((rank_spad, TN),
                                 lambda s, i, j, nj_inner=nj_inner: (0, s * nj_inner + j)),
                    # bias: fully resident, sliced in-kernel.
                    pl.BlockSpec((1, out_pad), lambda s, i, j: (0, 0),
                                 **resident_kw),
                ],
                out_specs=pl.BlockSpec(
                    (TB, TN),
                    lambda s, i, j, nj_inner=nj_inner: (i, s * nj_inner + j)),
                scratch_shapes=[pltpu.VMEM((TB, rank_spad), cdt)],
            ),
            compiler_params=pltpu.CompilerParams(
                # j (axis 2) must remain "arbitrary": the t scratch is reused
                # across it (see invariant in the kernel docstring).
                dimension_semantics=("parallel", "parallel", "arbitrary"),
                vmem_limit_bytes=int(budget),
            ),
            cost_estimate=cost,
        )(xp, up, vtp, bp)

        if B_pad != B or out_pad != out_dim:
            y_pad = y_pad[:B, :out_dim]
        return y_pad

    return lambda x: fwd(x, up, vtp, bp)


def low_rank_linear(x, weight_u, weight_v, bias, *, compute_dtype=None):
    """One-shot convenience wrapper (weights re-padded per call)."""
    return make_low_rank_linear(weight_u, weight_v, bias,
                                compute_dtype=compute_dtype)(x)


def init_low_rank_linear_params(key, in_dim, out_dim, rank, dtype=jnp.float32):
    """Mirrors LowRankLinear.__init__ initialization (deterministic given key)."""
    var = 6.0 / (in_dim + out_dim)
    var /= rank
    var *= 2
    bound = math.sqrt(var)
    k_u, k_v, k_b = jax.random.split(key, 3)
    weight_u = jax.random.uniform(k_u, (rank, in_dim), dtype, -bound, bound)
    weight_v = jax.random.uniform(k_v, (out_dim, rank), dtype, -bound, bound)
    # PyTorch leaves bias uninitialized (torch.empty); use a deterministic
    # small uniform so the run is reproducible.
    bias = jax.random.uniform(k_b, (out_dim,), dtype, -bound, bound)
    return weight_u, weight_v, bias


if __name__ == "__main__":
    B, in_dim, out_dim, rank = 8, 32, 32, 8

    key = jax.random.PRNGKey(0)
    k_params, k_x = jax.random.split(key)
    weight_u, weight_v, bias = init_low_rank_linear_params(
        k_params, in_dim, out_dim, rank
    )
    x = jax.random.normal(k_x, (B, in_dim), jnp.float32)

    # Reference (pure JAX): torch multi_dot([V, U, x.T]).T + bias
    y_ref = x @ weight_u.T @ weight_v.T + bias

    # f32 path (weights padded once at construction).
    fwd = make_low_rank_linear(weight_u, weight_v, bias)
    y = jax.block_until_ready(fwd(x))
    assert y.shape == (B, out_dim)
    assert jnp.allclose(y, y_ref, atol=1e-5, rtol=1e-5)

    # bf16-operand path (f32 accumulation) — MXU-native on v6e/v7x.
    fwd_bf16 = make_low_rank_linear(weight_u, weight_v, bias,
                                    compute_dtype=jnp.bfloat16)
    y_bf16 = jax.block_until_ready(fwd_bf16(x))
    assert y_bf16.shape == (B, out_dim)
    assert jnp.allclose(y_bf16, y_ref, atol=5e-2, rtol=5e-2)

    print("KERNEL_OK")
</pallas_src>

<mosaic_0001>
module attributes {stable_mosaic.version = 11 : i64} {
  func.func @_low_rank_kernel(%arg0: i32, %arg1: i32, %arg2: i32, %arg3: memref<8x128xf32, #tpu.memory_space<vmem>>, %arg4: memref<8x128xf32, #tpu.memory_space<vmem>>, %arg5: memref<8x128xf32, #tpu.memory_space<vmem>>, %arg6: memref<1x128xf32, #tpu.memory_space<vmem>>, %arg7: memref<8x128xf32, #tpu.memory_space<vmem>>, %arg8: memref<8x8xf32, #tpu.memory_space<vmem>>) attributes {dimension_semantics = [#tpu.dimension_semantics<parallel>, #tpu.dimension_semantics<parallel>, #tpu.dimension_semantics<arbitrary>], iteration_bounds = array<i64: 1, 1, 1>, scalar_prefetch = 0 : i64, scratch_operands = 1 : i64, tpu.core_type = #tpu.core_type<tc>, window_params = [{transform_indices = @transform_0, window_bounds = array<i64: 8, 128>}, {pipeline_mode = #tpu.pipeline_mode<synchronous>, transform_indices = @transform_1, window_bounds = array<i64: 8, 128>}, {transform_indices = @transform_2, window_bounds = array<i64: 8, 128>}, {pipeline_mode = #tpu.pipeline_mode<synchronous>, transform_indices = @transform_3, window_bounds = array<i64: 1, 128>}, {transform_indices = @transform_4, window_bounds = array<i64: 8, 128>}]} {
    %c0_i32 = arith.constant 0 : i32
    %0 = arith.cmpi eq, %arg2, %c0_i32 : i32
    %1 = arith.extui %0 : i1 to i32
    %c0_i32_0 = arith.constant 0 : i32
    %2 = arith.cmpi ne, %1, %c0_i32_0 : i32
    scf.if %2 {
      %c0_7 = arith.constant 0 : index
      %c0_8 = arith.constant 0 : index
      %15 = vector.load %arg3[%c0_7, %c0_8] : memref<8x128xf32, #tpu.memory_space<vmem>>, vector<8x128xf32>
      %c0_9 = arith.constant 0 : index
      %c0_10 = arith.constant 0 : index
      %16 = vector.load %arg4[%c0_9, %c0_10] : memref<8x128xf32, #tpu.memory_space<vmem>>, vector<8x128xf32>
      %cst_11 = arith.constant dense<0.000000e+00> : vector<8x8xf32>
      %17 = tpu.matmul %15, %16, %cst_11 {dimension_numbers = #tpu.dot_dimension_numbers<[1], [1], [0], [0], [0, 0, 1, 0], [], []>} : vector<8x128xf32>, vector<8x128xf32>, vector<8x8xf32> -> vector<8x8xf32>
      %c0_12 = arith.constant 0 : index
      %c0_13 = arith.constant 0 : index
      %18 = vector.load %arg8[%c0_12, %c0_13] : memref<8x8xf32, #tpu.memory_space<vmem>>, vector<8x8xf32>
      tpu.vector_store %arg8[%c0_12, %c0_13], %17 {strides = array<i32>} : memref<8x8xf32, #tpu.memory_space<vmem>>, vector<8x8xf32>,
    } else {
    }
    %c0 = arith.constant 0 : index
    %c0_1 = arith.constant 0 : index
    %3 = vector.load %arg8[%c0, %c0_1] : memref<8x8xf32, #tpu.memory_space<vmem>>, vector<8x8xf32>
    %c0_2 = arith.constant 0 : index
    %c0_3 = arith.constant 0 : index
    %4 = vector.load %arg5[%c0_2, %c0_3] : memref<8x128xf32, #tpu.memory_space<vmem>>, vector<8x128xf32>
    %cst = arith.constant dense<0.000000e+00> : vector<8x128xf32>
    %5 = tpu.matmul %3, %4, %cst {dimension_numbers = #tpu.dot_dimension_numbers<[1], [0], [0], [1], [0, 0, 1, 1], [], []>} : vector<8x8xf32>, vector<8x128xf32>, vector<8x128xf32> -> vector<8x128xf32>
    %c1_i32 = arith.constant 1 : i32
    %6 = arith.muli %arg0, %c1_i32 : i32
    %7 = arith.addi %6, %arg2 : i32
    %c128_i32 = arith.constant 128 : i32
    %8 = arith.muli %7, %c128_i32 : i32
    %9 = tpu.assume_multiple %8, 128 : i32
    %c0_4 = arith.constant 0 : index
    %10 = arith.index_cast %9 : i32 to index
    %11 = vector.load %arg6[%c0_4, %10] : memref<1x128xf32, #tpu.memory_space<vmem>>, vector<1x128xf32>
    %12 = vector.broadcast %11 : vector<1x128xf32> to vector<8x128xf32>
    %13 = arith.addf %5, %12 : vector<8x128xf32>
    %c0_5 = arith.constant 0 : index
    %c0_6 = arith.constant 0 : index
    %14 = vector.load %arg7[%c0_5, %c0_6] : memref<8x128xf32, #tpu.memory_space<vmem>>, vector<8x128xf32>
    tpu.vector_store %arg7[%c0_5, %c0_6], %13 {strides = array<i32>} : memref<8x128xf32, #tpu.memory_space<vmem>>, vector<8x128xf32>,
    return
  }
  func.func @transform_0(%arg0: i32, %arg1: i32, %arg2: i32) -> (i32, i32) {
    %c0_i32 = arith.constant 0 : i32
    %c0_i32_0 = arith.constant 0 : i32
    return %arg1, %c0_i32 : i32, i32
  }
  func.func @transform_1(%arg0: i32, %arg1: i32, %arg2: i32) -> (i32, i32) {
    %c0_i32 = arith.constant 0 : i32
    %c0_i32_0 = arith.constant 0 : i32
    %c0_i32_1 = arith.constant 0 : i32
    return %c0_i32, %c0_i32_0 : i32, i32
  }
  func.func @transform_2(%arg0: i32, %arg1: i32, %arg2: i32) -> (i32, i32) {
    %c1_i32 = arith.constant 1 : i32
    %0 = arith.muli %arg0, %c1_i32 : i32
    %1 = arith.addi %0, %arg2 : i32
    %c0_i32 = arith.constant 0 : i32
    %c0_i32_0 = arith.constant 0 : i32
    return %c0_i32, %1 : i32, i32
  }
  func.func @transform_3(%arg0: i32, %arg1: i32, %arg2: i32) -> (i32, i32) {
    %c0_i32 = arith.constant 0 : i32
    %c0_i32_0 = arith.constant 0 : i32
    %c0_i32_1 = arith.constant 0 : i32
    return %c0_i32, %c0_i32_0 : i32, i32
  }
  func.func @transform_4(%arg0: i32, %arg1: i32, %arg2: i32) -> (i32, i32) {
    %c1_i32 = arith.constant 1 : i32
    %0 = arith.muli %arg0, %c1_i32 : i32
    %1 = arith.addi %0, %arg2 : i32
    %c0_i32 = arith.constant 0 : i32
    return %arg1, %1 : i32, i32
  }
}

</mosaic_0001>

<bundles_post_ra>
// kernel: fwd.1
= control target key start
LH: loop header
LB: loop body
LE: loop exit
PB: predicated region body
PF: predicated region fallthrough
CT: control target
= control target key end

     0   :  { %s322_s0 = inlined_call_operand.vmem [shape: f32[8,128], index: 0, kind: input, shape index: {}]   ;;  %s323_s1 = inlined_call_operand.vmem [shape: f32[8,128], index: 1, kind: input, shape index: {}]   ;;  %s324_s2 = inlined_call_operand.vmem [shape: f32[8,128], index: 2, kind: input, shape index: {}]   ;;  %s325_s3 = inlined_call_operand.vmem [shape: f32[1,128], index: 3, kind: input, shape index: {}]   ;;  %s326_s4 = inlined_call_operand.hbm [shape: f32[8,128], index: 4, kind: output, shape index: {}]  }
   0x1   :  { %v41_v0 = vld [vmem:[%s323_s1] sm:$0xff] }
   0x2   :  { %9 = vsyncpa [#allocation4], 0  ;;  %v270_v1 = vmov 0.0   ;;  %vm271_vm0 = vmmov 0   ;;  %v40_v2 = vld [vmem:[%s322_s0] sm:$0xff]  ;;  %vm112_vm1 = vcmask 64512  }
   0x3   :  { %233 = vmatprep.subr.mxu0 %v270_v1  ;;  %235 = vmatprep.mubr.msk.f32.mxu0 %vm271_vm0, %v270_v1  ;;  %v115_v3 = vld [vmem:[%s324_s2] sm:$0xff]  ;;  %s272_s22 = smov [#allocation3]  }
   0x4   :  { %234 = vmatpush3.xpose.msra.mxu0 %v41_v0  ;;  %238 = vmatprep.subr.mxu1 %v270_v1  ;;  %v227_v7 = vld [vmem:[%s325_s3] ss:$0 sm:$0xff]  ;;  %s212_s0 = sshll.u32 %s272_s22, 4  ;;  %s213_s0 = int_to_ptr.vmem [resolvable:$true] %s212_s0 }
   0x5   :  { %240 = vmatprep.mubr.msk.f32.mxu1 %vm271_vm0, %v270_v1  ;;  %239 = vmatpush3.msra.mxu1 %v115_v3  ;;  %s246_s23 = scalar_lea.vmem %s213_s0, 128  ;;  %p251_p1 = scmp.lt.s32.totalorder %s213_s0, %s213_s0 }
   0x6   :  { %p247_p0 = scmp.ne.s32.totalorder %s213_s0, %s246_s23  ;;  %p252_p2 = scmp.lt.s32.totalorder %s246_s23, %s246_s23 }
   0x7   :  { %236 = vmatmul.mubr.f32.vlgmr.msra.gmra.mrb[0].mxu0 %v40_v2 }
   0x8   :  { %p253_p3 = por %p252_p2, %p251_p1 }
   0xa   :  { %p254_p4 = pnand %p253_p3, %p247_p0 }
  0xda   :  { %v108_v4 = vpop.f32.mrb[0].mxu0 }
  0xdb   :  { %113 = vst.msk [vmem:[#allocation2] sm:$0xff] %vm112_vm1, %v108_v4  ;;  %v237_v5 = vpop.f32.mrb[1].mxu0 }
  0xe2   :  { %v114_v6 = vld [vmem:[#allocation2] sm:$0xff] }
  0xe3   :  { %241 = vmatmul.mubr.msk.f32.vlgmr.msra.gmra.mrb[0].mxu1 %vm112_vm1, %v114_v6 }
 0x1b6   :  { %v198_v8 = vpop.f32.mrb[0].mxu1 }
 0x1b7   :  { %v199_v9 = vadd.f32 %v227_v7, %v198_v8  ;;  %v242_v10 = vpop.f32.mrb[1].mxu1 }
 0x1b9   :  { %202 = vst [vmem:[#allocation3] sm:$0xff] %v199_v9 }
 0x1ba   :  { %257 = shalt.err (!%p254_p4)
}
 0x1bb   :  { %s258_s25 = scalar_lea.hbm %s326_s4, 128 }
 0x1bc   :  { %p259_p5 = scmp.ne.s32.totalorder %s326_s4, %s258_s25  ;;  %p262_p6 = scmp.lt.u32.totalorder %s258_s25, %s326_s4 }
 0x1be   :  { %p264_p7 = pnand %p262_p6, %p259_p5 }
 0x1c0   :  { %267 = shalt.err (!%p264_p7)
}
 0x1c1   :  { %215 = dma.vmem_to_hbm [thread:$0]  %s213_s0, 128, %s326_s4, [#allocation4]  }
 0x1c2   :  { %268 = dma.done.wait [#allocation4], 128  }
 0x1c3   :  { %269 = vsyncadd [#allocation4], 4294967168 }
 0x1c4   :  { %219 = vsyncpa [#allocation4], 1 }

</bundles_post_ra>
